<compile_context>
chip_gen: v6e
topology: v6e:2x2x1
jax: 0.10.0
libtpu: 0.0.40
codegen_flags: <defaults>
</compile_context>

<pallas_src>
import functools

import jax
import jax.numpy as jnp
from jax.experimental import pallas as pl
from jax.experimental.pallas import tpu as pltpu

_WINDOW = 10
_WINDOW_STARTS = tuple(range(0, 30 + 1, 5))       # 0, 5, ..., 30 -> 7 windows
_NUM_GATHER = _WINDOW_STARTS[-1] + _WINDOW        # only the top-40 columns are used


def _cdiv(a, b):
    return -(-a // b)


def _round_up(v, m):
    return _cdiv(v, m) * m


def _vmem_capacity_bytes():
    """Physical VMEM of the current generation (128 MiB v5e/v6e, 64 MiB v7x)."""
    try:
        cap = getattr(pltpu.get_tpu_info(), "vmem_capacity_bytes", None)
        if cap:
            return int(cap)
    except Exception:
        pass
    return 64 * 1024 * 1024   # conservative (v7x-sized) fallback; safe everywhere


def _pick_batch_tile(n_rows, num_classes, in_itemsize, vmem_cap):
    """Largest batch tile whose VMEM footprint (double-buffered inputs + ~3 live
    full-width f32 temporaries inside the kernel) stays within ~40% of physical
    VMEM, capped so large batches produce >= 2 grid steps (v7x 2-TC sharding)."""
    per_row = 2 * 2 * num_classes * in_itemsize + 3 * num_classes * 4
    budget = max(4 << 20, (vmem_cap * 2) // 5)        # ~40% of VMEM
    tile = max(16, min(1024, (budget // per_row) // 16 * 16))
    if n_rows > 256:
        # prefer >= 2 grid steps; costs one extra ~0.35us step on single-TC chips
        tile = min(tile, _round_up(_cdiv(n_rows, 2), 16))
    if n_rows <= tile:
        return n_rows          # single full-extent block (always a legal block)
    return tile                # multiple of 16 -> covers bf16 sublane packing


def _pskd_main_ce_kernel(out_ref, tgt_ref, part_ref, *, n_rows, tile):
    """Partial sum, over the rows of one batch tile, of
         sum_c -targets[r, c] * log_softmax(output[r, :])[c]
    written as a single f32 into part_ref (shape (1, 1, 1))."""
    x = out_ref[...].astype(jnp.float32)               # (tile, C) logits
    t = tgt_ref[...].astype(jnp.float32)               # (tile, C) soft targets

    m = jnp.max(x, axis=1, keepdims=True)                                 # (tile, 1)
    lse = jnp.log(jnp.sum(jnp.exp(x - m), axis=1, keepdims=True))         # (tile, 1)
    sum_t = jnp.sum(t, axis=1, keepdims=True)                             # (tile, 1)
    sum_tx = jnp.sum(t * x, axis=1, keepdims=True)                        # (tile, 1)
    # sum_c -t * (x - m - lse) == (m + lse) * sum_c(t) - sum_c(t * x)
    row = (m + lse) * sum_t - sum_tx                                      # (tile, 1)

    # Mask rows of the ragged last tile (their block contents are undefined);
    # jnp.where is a select, so NaN/Inf garbage in padded rows cannot leak.
    row_ids = pl.program_id(0) * tile + jax.lax.broadcasted_iota(
        jnp.int32, (tile, 1), 0)
    row = jnp.where(row_ids < n_rows, row, 0.0)

    part_ref[0] = jnp.sum(row, keepdims=True)                             # (1, 1)


@functools.partial(jax.jit, static_argnames=("alpha",))
def pskd_v10_loss(output, targets, *, alpha):
    n, c = output.shape
    assert targets.shape == (n, c)
    if c < _NUM_GATHER:
        raise ValueError(f"need at least {_NUM_GATHER} classes, got {c}")

    vmem_cap = _vmem_capacity_bytes()
    itemsize = max(jnp.dtype(output.dtype).itemsize,
                   jnp.dtype(targets.dtype).itemsize)
    tile = _pick_batch_tile(n, c, itemsize, vmem_cap)
    num_tiles = _cdiv(n, tile)

    # ---- main CE term: Pallas kernel over batch tiles (no input padding) ----
    partials = pl.pallas_call(
        functools.partial(_pskd_main_ce_kernel, n_rows=n, tile=tile),
        out_shape=jax.ShapeDtypeStruct((num_tiles, 1, 1), jnp.float32),
        grid_spec=pltpu.PrefetchScalarGridSpec(
            num_scalar_prefetch=0,
            grid=(num_tiles,),
            in_specs=[
                pl.BlockSpec((tile, c), lambda i: (i, 0)),
                pl.BlockSpec((tile, c), lambda i: (i, 0)),
            ],
            out_specs=pl.BlockSpec((1, 1, 1), lambda i: (i, 0, 0)),
        ),
        compiler_params=pltpu.CompilerParams(
            # independent per-tile partial sums -> batch tiles can be sharded
            # across TensorCores (v7x megacore); final reduce happens outside.
            dimension_semantics=("parallel",),
            vmem_limit_bytes=(vmem_cap * 3) // 4,
        ),
    )(output, targets)

    inv_n = jnp.float32(1.0) / jnp.float32(n)
    main_loss = jnp.sum(partials) * inv_n                 # .mean(0).sum()

    # ---- 7-window sub-loss on the gathered top-40 columns (plain XLA) ----
    # torch.argsort(descending=True)[:, :40] + gather has no clean in-kernel
    # equivalent; the windowed CE itself stays in XLA because its (N, 40) data
    # is negligible and 10-wide windows waste 90%+ of vreg lanes in-kernel.
    top_vals, top_idx = jax.lax.top_k(targets, _NUM_GATHER)
    g_out = jnp.take_along_axis(output, top_idx, axis=1).astype(jnp.float32)
    g_tgt = top_vals.astype(jnp.float32)
    sub_rows = jnp.zeros((n,), jnp.float32)
    for w in _WINDOW_STARTS:
        so = g_out[:, w:w + _WINDOW]
        st = jax.nn.softmax(g_tgt[:, w:w + _WINDOW], axis=1)
        sub_rows = sub_rows + jnp.sum(-st * jax.nn.log_softmax(so, axis=1), axis=1)
    sub_loss = jnp.sum(sub_rows) * inv_n                  # 7 x .mean(0).sum()

    return (main_loss + jnp.float32(alpha) * sub_loss).astype(jnp.float32)


def pskd_v10_loss_ref(output, targets, alpha):
    """Pure-JAX reference matching the PyTorch module."""
    output = output.astype(jnp.float32)
    targets = targets.astype(jnp.float32)
    logp = jax.nn.log_softmax(output, axis=1)
    loss = (-targets * logp).mean(0).sum()
    top_vals, top_idx = jax.lax.top_k(targets, _NUM_GATHER)
    g_out = jnp.take_along_axis(output, top_idx, axis=1)
    for w in _WINDOW_STARTS:
        so = g_out[:, w:w + _WINDOW]
        st = jax.nn.softmax(top_vals[:, w:w + _WINDOW], axis=1)
        loss = loss + (-st * jax.nn.log_softmax(so, axis=1)).mean(0).sum() * alpha
    return loss


def _make_inputs(key, n, c, alpha):
    k1, k2, k3 = jax.random.split(key, 3)
    output = jax.random.normal(k1, (n, c), dtype=jnp.float32)
    # PSKD soft targets: alpha * prev-epoch softmax + (1 - alpha) * hard labels
    soft = jax.nn.softmax(jax.random.normal(k2, (n, c), dtype=jnp.float32), axis=1)
    hard = jax.nn.one_hot(jax.random.randint(k3, (n,), 0, c), c, dtype=jnp.float32)
    targets = alpha * soft + (1.0 - alpha) * hard
    return output, targets


if __name__ == "__main__":
    alpha = 0.8
    key = jax.random.PRNGKey(0)
    ka, kb = jax.random.split(key)

    # small CIFAR-100-style case (single batch tile)
    out_a, tgt_a = _make_inputs(ka, 8, 100, alpha)
    loss_a = pskd_v10_loss(out_a, tgt_a, alpha=alpha)
    jax.block_until_ready(loss_a)
    ref_a = pskd_v10_loss_ref(out_a, tgt_a, alpha)
    assert jnp.allclose(loss_a, ref_a, rtol=1e-4, atol=1e-4), (loss_a, ref_a)

    # ragged multi-tile case (exercises the in-kernel tail-row masking)
    out_b, tgt_b = _make_inputs(kb, 300, 64, alpha)
    loss_b = pskd_v10_loss(out_b, tgt_b, alpha=alpha)
    jax.block_until_ready(loss_b)
    ref_b = pskd_v10_loss_ref(out_b, tgt_b, alpha)
    assert jnp.allclose(loss_b, ref_b, rtol=1e-4, atol=1e-4), (loss_b, ref_b)

    print("KERNEL_OK")
</pallas_src>

<mosaic_0001>
module attributes {stable_mosaic.version = 11 : i64} {
  func.func @_pskd_main_ce_kernel(%arg0: i32, %arg1: memref<8x100xf32, #tpu.memory_space<vmem>>, %arg2: memref<8x100xf32, #tpu.memory_space<vmem>>, %arg3: memref<1x1x1xf32, #tpu.memory_space<vmem>>) attributes {dimension_semantics = [#tpu.dimension_semantics<parallel>], iteration_bounds = array<i64: 1>, scalar_prefetch = 0 : i64, scratch_operands = 0 : i64, tpu.core_type = #tpu.core_type<tc>, window_params = [{transform_indices = @transform_0, window_bounds = array<i64: 8, 100>}, {transform_indices = @transform_1, window_bounds = array<i64: 8, 100>}, {transform_indices = @transform_2, window_bounds = array<i64: 1, 1, 1>}]} {
    %c0 = arith.constant 0 : index
    %c0_0 = arith.constant 0 : index
    %0 = vector.load %arg1[%c0, %c0_0] : memref<8x100xf32, #tpu.memory_space<vmem>>, vector<8x100xf32>
    %c0_1 = arith.constant 0 : index
    %c0_2 = arith.constant 0 : index
    %1 = vector.load %arg2[%c0_1, %c0_2] : memref<8x100xf32, #tpu.memory_space<vmem>>, vector<8x100xf32>
    %cst = arith.constant dense<0xFF800000> : vector<8xf32>
    %2 = vector.multi_reduction <maximumf>, %0, %cst [1] : vector<8x100xf32> to vector<8xf32>
    %3 = vector.shape_cast %2 : vector<8xf32> to vector<8x1xf32>
    %4 = vector.broadcast %3 : vector<8x1xf32> to vector<8x100xf32>
    %5 = arith.subf %0, %4 : vector<8x100xf32>
    %6 = math.exp %5 : vector<8x100xf32>
    %cst_3 = arith.constant dense<0.000000e+00> : vector<8xf32>
    %7 = vector.multi_reduction <add>, %6, %cst_3 [1] : vector<8x100xf32> to vector<8xf32>
    %8 = vector.shape_cast %7 : vector<8xf32> to vector<8x1xf32>
    %9 = math.log %8 : vector<8x1xf32>
    %cst_4 = arith.constant dense<0.000000e+00> : vector<8xf32>
    %10 = vector.multi_reduction <add>, %1, %cst_4 [1] : vector<8x100xf32> to vector<8xf32>
    %11 = vector.shape_cast %10 : vector<8xf32> to vector<8x1xf32>
    %12 = arith.mulf %1, %0 : vector<8x100xf32>
    %cst_5 = arith.constant dense<0.000000e+00> : vector<8xf32>
    %13 = vector.multi_reduction <add>, %12, %cst_5 [1] : vector<8x100xf32> to vector<8xf32>
    %14 = vector.shape_cast %13 : vector<8xf32> to vector<8x1xf32>
    %15 = arith.addf %3, %9 : vector<8x1xf32>
    %16 = arith.mulf %15, %11 : vector<8x1xf32>
    %17 = arith.subf %16, %14 : vector<8x1xf32>
    %c8_i32 = arith.constant 8 : i32
    %18 = arith.muli %arg0, %c8_i32 : i32
    %19 = tpu.iota {dimensions = array<i32: 0>} : vector<8x1xi32>
    %20 = vector.broadcast %18 : i32 to vector<8x1xi32>
    %21 = arith.addi %20, %19 : vector<8x1xi32>
    %c8_i32_6 = arith.constant 8 : i32
    %22 = vector.broadcast %c8_i32_6 : i32 to vector<8x1xi32>
    %23 = arith.cmpi slt, %21, %22 : vector<8x1xi32>
    %cst_7 = arith.constant 0.000000e+00 : f32
    %24 = vector.broadcast %cst_7 : f32 to vector<8x1xf32>
    %25 = arith.select %23, %17, %24 : vector<8x1xi1>, vector<8x1xf32>
    %26 = vector.shape_cast %25 : vector<8x1xf32> to vector<1x8x1xf32>
    %cst_8 = arith.constant dense<0.000000e+00> : vector<1xf32>
    %27 = vector.multi_reduction <add>, %26, %cst_8 [1, 2] : vector<1x8x1xf32> to vector<1xf32>
    %28 = vector.shape_cast %27 : vector<1xf32> to vector<1x1x1xf32>
    %29 = vector.extract %28[0, 0, 0] : f32 from vector<1x1x1xf32>
    %30 = vector.broadcast %29 : f32 to vector<1x1xf32>
    %c0_9 = arith.constant 0 : index
    %c0_10 = arith.constant 0 : index
    %c0_11 = arith.constant 0 : index
    %31 = vector.load %arg3[%c0_9, %c0_10, %c0_11] : memref<1x1x1xf32, #tpu.memory_space<vmem>>, vector<1x1x1xf32>
    %32 = vector.shape_cast %31 : vector<1x1x1xf32> to vector<1x1xf32>
    %33 = vector.shape_cast %30 : vector<1x1xf32> to vector<1x1x1xf32>
    tpu.vector_store %arg3[%c0_9, %c0_10, %c0_11], %33 {strides = array<i32>} : memref<1x1x1xf32, #tpu.memory_space<vmem>>, vector<1x1x1xf32>,
    return
  }
  func.func @transform_0(%arg0: i32) -> (i32, i32) {
    %c0_i32 = arith.constant 0 : i32
    %c0_i32_0 = arith.constant 0 : i32
    return %arg0, %c0_i32 : i32, i32
  }
  func.func @transform_1(%arg0: i32) -> (i32, i32) {
    %c0_i32 = arith.constant 0 : i32
    %c0_i32_0 = arith.constant 0 : i32
    return %arg0, %c0_i32 : i32, i32
  }
  func.func @transform_2(%arg0: i32) -> (i32, i32, i32) {
    %c0_i32 = arith.constant 0 : i32
    %c0_i32_0 = arith.constant 0 : i32
    %c0_i32_1 = arith.constant 0 : i32
    return %arg0, %c0_i32, %c0_i32_0 : i32, i32, i32
  }
}

</mosaic_0001>

<bundles_post_ra>
// kernel: pskd_v10_loss.1
= control target key start
LH: loop header
LB: loop body
LE: loop exit
PB: predicated region body
PF: predicated region fallthrough
CT: control target
= control target key end

     0   :  { %vm14_vm0 = vcmask 818176   ;;  %s125_s0 = inlined_call_operand.vmem [shape: f32[8,100], index: 0, kind: input, shape index: {}]   ;;  %s126_s1 = inlined_call_operand.vmem [shape: f32[8,100], index: 1, kind: input, shape index: {}]   ;;  %s127_s2 = inlined_call_operand.hbm [shape: f32[1,1,1], index: 2, kind: output, shape index: {}]  }
   0x1   :  { %v12_v0 = vld [vmem:[%s125_s0] sm:$0xff] }
   0x2   :  { %7 = vsyncpa [#allocation3], 0  ;;  %v15_v1 = vsel %vm14_vm0, %v12_v0, -inf  ;;  %v13_v2 = vld [vmem:[%s126_s1] sm:$0xff]  ;;  %vm43_vm1 = vcmask 7168   ;;  %s100_s0 = smov [#allocation2]  }
   0x3   :  { %16 = vmax.xlane.f32.xlu0 %v15_v1  ;;  %v26_v3 = vsel %vm14_vm0, %v13_v2, 0.0  ;;  %v29_v4 = vmul.f32 %v13_v2, %v12_v0  ;;  %s63_s1 = sshll.u32 %s100_s0, 4  ;;  %vm55_vm2 = vcmask 0   ;;  %s64_s1 = int_to_ptr.vmem [resolvable:$true] %s63_s1 }
   0x4   :  { %27 = vadd.xlane.f32.xlu1 %v26_v3  ;;  %s78_s14 = scalar_lea.vmem %s64_s1, 16  ;;  %s82_s15 = scalar_lea.vmem %s64_s1, 32 }
   0x5   :  { %v30_v5 = vsel %vm14_vm0, %v29_v4, 0.0  ;;  %p79_p0 = scmp.ne.s32.totalorder %s64_s1, %s78_s14  ;;  %p83_p1 = scmp.lt.s32.totalorder %s64_s1, %s64_s1 }
   0x6   :  { %p84_p2 = scmp.lt.s32.totalorder %s82_s15, %s78_s14 }
   0x8   :  { %31 = vadd.xlane.f32.xlu1 %v30_v5  ;;  %p85_p3 = por %p84_p2, %p83_p1 }
   0xa   :  { %p86_p4 = pnand %p85_p3, %p79_p0 }
  0x8c   :  { %v17_v6 = vpop.xlane.xlu0 %16 }
  0x8d   :  { %v18_v7 = vsub.f32 %v12_v0, %v17_v6  ;;  %v28_v12 = vpop.xlane.xlu1 %27 }
  0x8f   :  { %v19_v8 = vmul.f32 1.442695, %v18_v7 }
  0x91   :  { %74 = vpow2.f32 %v19_v8  ;;  %v32_v16 = vpop.xlane.xlu1 %31 }
  0x9e   :  { %v75_v9 = vpop.eup %74 }
  0x9f   :  { %v21_v10 = vsel %vm14_vm0, %v75_v9, 0.0 }
  0xa0   :  { %22 = vadd.xlane.f32.xlu0 %v21_v10 }
 0x129   :  { %v23_v11 = vpop.xlane.xlu0 %22 }
 0x12a   :  { %76 = vlog2.f32 %v23_v11 }
 0x137   :  { %v77_v13 = vpop.eup %76 }
 0x138   :  { %v25_v14 = vmul.f32 0.6931472, %v77_v13 }
 0x13a   :  { %v33_v15 = vadd.f32 %v25_v14, %v17_v6 }
 0x13c   :  { %v34_v17 = vmul.f32 %v33_v15, %v28_v12 }
 0x13e   :  { %v35_v18 = vsub.f32 %v34_v17, %v32_v16 }
 0x140   :  { %v44_v19 = vsel %vm43_vm1, %v35_v18, 0.0 }
 0x141   :  { %45 = vadd.xlane.f32.xlu0 %v44_v19 }
 0x1ca   :  { %v46_v20 = vpop.xlane.xlu0 %45 }
 0x1cb   :  { %v47_v21 = vrot.slane %v46_v20, 4 }
 0x1cd   :  { %v48_v22 = vadd.f32 %v47_v21, %v46_v20 }
 0x1cf   :  { %v49_v23 = vrot.slane %v48_v22, 2 }
 0x1d1   :  { %v50_v24 = vadd.f32 %v49_v23, %v48_v22 }
 0x1d3   :  { %v51_v25 = vrot.slane %v50_v24, 1 }
 0x1d5   :  { %v52_v26 = vadd.f32 %v51_v25, %v50_v24 }
 0x1d7   :  { %71 = vpush %v52_v26 }
 0x208   :  { %s72_s13 = spop %71 }
 0x209   :  { %v54_v27 = vstv %s72_s13 }
 0x20a   :  { %56 = vst.msk [vmem:[#allocation2] sm:$0x1] %vm55_vm2, %v54_v27 }
 0x20b   :  { %89 = shalt.err (!%p86_p4)
}
 0x20c   :  { %66 = dma.vmem_to_hbm [thread:$0]  %s64_s1, 16, %s127_s2, [#allocation3]  }
 0x20d   :  { %98 = dma.done.wait [#allocation3], 16  }
 0x20e   :  { %99 = vsyncadd [#allocation3], 4294967280 }
 0x20f   :  { %70 = vsyncpa [#allocation3], 1 }

</bundles_post_ra>
